<compile_context>
chip_gen: v6e
topology: v6e:2x2x1
jax: 0.10.0
libtpu: 0.0.40
codegen_flags: <defaults>
</compile_context>

<pallas_src>
import functools

import jax
import jax.numpy as jnp
from jax.experimental import pallas as pl
from jax.experimental.pallas import tpu as pltpu


# ----------------------------------------------------------------------------- helpers

_VMEM_TILE_BUDGET = 12 * 1024 * 1024  # double-buffered in+out bytes per grid step
_VMEM_LIMIT_BYTES = 32 * 1024 * 1024  # safe on v5e/v6e/v7x


def _round_up(x, n):
    return ((x + n - 1) // n) * n


def _sublane_multiple(dtype):
    itemsize = jnp.dtype(dtype).itemsize
    return {4: 8, 2: 16, 1: 32}.get(itemsize, 8)


def _median_of_taps(vals):
    """Lower-middle median (sorted[(k-1)//2]) of k equally-shaped arrays, VPU min/max only."""
    k = len(vals)
    m = (k - 1) // 2
    if k == 1:
        return vals[0]
    if k == 2:
        return jnp.minimum(vals[0], vals[1])
    if k == 3:
        a, b, c = vals
        lo = jnp.minimum(a, b)
        hi = jnp.maximum(a, b)
        return jnp.maximum(lo, jnp.minimum(hi, c))
    # General k: partial selection network -- only fix positions 0..m (prunes the full
    # bubble sort; ops whose result never reaches sorted[m] are never emitted).
    vals = list(vals)
    for i in range(m + 1):
        for j in range(k - 1, i, -1):
            lo = jnp.minimum(vals[j - 1], vals[j])
            hi = jnp.maximum(vals[j - 1], vals[j])
            vals[j - 1], vals[j] = lo, hi
    return vals[m]


# ----------------------------------------------------------------------------- kernels

def _median_rows_kernel(x_ref, o_ref, *, k, l_out):
    # x_ref: (M_t, W_in) row slab; o_ref: (M_t, l_out).  stride == 1: the k window taps are
    # statically shifted lane slices of the same block (fused unfold).
    taps = [x_ref[:, i:i + l_out] for i in range(k)]
    o_ref[...] = _median_of_taps(taps)


def _median_stacked_kernel(x_ref, o_ref, *, k):
    # x_ref: (k, M_t, L_t) pre-strided taps; o_ref: (M_t, L_t).  Used for stride > 1.
    taps = [x_ref[i] for i in range(k)]
    o_ref[...] = _median_of_taps(taps)


# ----------------------------------------------------------------------------- pallas wrappers

def _median_filter_rows_stride1(x2d, k, n_out):
    """x2d: (M, W_pad) padded rows -> (M, n_out) median over k-wide windows, stride 1."""
    m, w = x2d.shape
    itemsize = jnp.dtype(x2d.dtype).itemsize
    sub = _sublane_multiple(x2d.dtype)

    l_p = _round_up(max(n_out, 1), 128)           # lane-dense output width
    w_in = _round_up(l_p + k - 1, 128)            # input width incl. window halo
    m_p = _round_up(m, sub)

    # Row-tile so the double-buffered (input + output) footprint stays under budget.
    per_row = 2 * (w_in + l_p) * itemsize
    cap = max(sub, (_VMEM_TILE_BUDGET // per_row) // sub * sub)
    m_t = min(m_p, min(512, cap))
    m_pp = _round_up(m_p, m_t)

    x_in = jnp.pad(x2d, ((0, m_pp - m), (0, w_in - w)))
    kernel = functools.partial(_median_rows_kernel, k=k, l_out=l_p)

    out = pl.pallas_call(
        kernel,
        out_shape=jax.ShapeDtypeStruct((m_pp, l_p), x2d.dtype),
        grid=(m_pp // m_t,),
        in_specs=[pl.BlockSpec((m_t, w_in), lambda i: (i, 0))],
        out_specs=pl.BlockSpec((m_t, l_p), lambda i: (i, 0)),
        compiler_params=pltpu.CompilerParams(
            dimension_semantics=("parallel",),
            vmem_limit_bytes=_VMEM_LIMIT_BYTES),
    )(x_in)
    return out[:m, :n_out]


def _median_reduce_stacked(taps_kml):
    """taps_kml: (k, M, L) -> (M, L) lower-middle median over axis 0 (stride > 1 path)."""
    k, m, l = taps_kml.shape
    itemsize = jnp.dtype(taps_kml.dtype).itemsize
    sub = _sublane_multiple(taps_kml.dtype)

    l_t = min(_round_up(max(l, 1), 128), 2048)
    per_elem = 2 * (k + 1) * itemsize
    cap = max(sub, (_VMEM_TILE_BUDGET // (per_elem * l_t)) // sub * sub)
    m_t = min(_round_up(m, sub), min(512, cap))
    m_p = _round_up(_round_up(m, sub), m_t)
    l_p = _round_up(l, l_t)

    x_in = jnp.pad(taps_kml, ((0, 0), (0, m_p - m), (0, l_p - l)))
    kernel = functools.partial(_median_stacked_kernel, k=k)

    out = pl.pallas_call(
        kernel,
        out_shape=jax.ShapeDtypeStruct((m_p, l_p), taps_kml.dtype),
        grid=(m_p // m_t, l_p // l_t),
        in_specs=[pl.BlockSpec((k, m_t, l_t), lambda i, j: (0, i, j))],
        out_specs=pl.BlockSpec((m_t, l_t), lambda i, j: (i, j)),
        compiler_params=pltpu.CompilerParams(
            dimension_semantics=("parallel", "parallel"),
            vmem_limit_bytes=_VMEM_LIMIT_BYTES),
    )(x_in)
    return out[:m, :l]


# ----------------------------------------------------------------------------- module

class MedianPool1d:
    """JAX/Pallas port of the PyTorch MedianPool1d module (forward pass only)."""

    def __init__(self, kernel_size=3, stride=1, padding=0, same=False):
        self.k = kernel_size
        self.stride = stride
        self.padding = padding
        self.same = same

    def _padding(self, x):
        if self.same:
            iw = x.shape[-1]
            if iw % self.stride == 0:
                pw = max(self.k - self.stride, 0)
            else:
                pw = max(self.k - iw % self.stride, 0)
            p_left = pw // 2
            p_right = pw - p_left
            return (p_left, p_right)
        else:
            pad = self.padding
            if isinstance(pad, int):
                # F.pad with a bare int is not strictly valid torch; interpret as symmetric.
                return (pad, pad)
            return tuple(pad)

    def __call__(self, x):
        # x: (B, C, W)
        p_left, p_right = self._padding(x)
        x_pad = jnp.pad(x, ((0, 0), (0, 0), (p_left, p_right)), mode="reflect")
        b, c, w_pad = x_pad.shape
        n_out = (w_pad - self.k) // self.stride + 1
        m = b * c
        x2d = x_pad.reshape(m, w_pad)

        if self.stride == 1:
            # Fused path: window extraction happens inside the kernel as shifted slices.
            med = _median_filter_rows_stride1(x2d, self.k, n_out)
        else:
            # stride > 1 fallback: k cheap strided slices stacked on a leading axis
            # (no gather, no minor-dim transpose), median reduced in a tiled kernel.
            taps = jnp.stack(
                [x2d[:, i::self.stride][:, :n_out] for i in range(self.k)], axis=0)
            med = _median_reduce_stacked(taps)

        return med.reshape(b, c, n_out)


# ----------------------------------------------------------------------------- reference + test

def _median_reference(x, k, stride, padding, same):
    """Pure-JAX reference reproducing torch semantics (lower-middle median)."""
    mod = MedianPool1d(k, stride, padding, same)
    p_left, p_right = mod._padding(x)
    x_pad = jnp.pad(x, ((0, 0), (0, 0), (p_left, p_right)), mode="reflect")
    w_pad = x_pad.shape[-1]
    n_out = (w_pad - k) // stride + 1
    starts = jnp.arange(n_out) * stride
    idx = starts[:, None] + jnp.arange(k)[None, :]
    windows = x_pad[:, :, idx]                                    # (B, C, L, k)
    return jnp.sort(windows, axis=-1)[..., (k - 1) // 2]


if __name__ == "__main__":
    key = jax.random.PRNGKey(0)
    B, C, W = 2, 4, 16
    x = jax.random.normal(key, (B, C, W), dtype=jnp.float32)

    # 1) Default config: median filter, k=3, stride=1, 'same' padding (fused path).
    pool = MedianPool1d(kernel_size=3, stride=1, padding=0, same=True)
    out = jax.block_until_ready(pool(x))
    ref = _median_reference(x, 3, 1, 0, True)
    assert out.shape == (B, C, W), out.shape
    assert jnp.allclose(out, ref), "k=3 stride=1 mismatch vs reference"

    # 2) Even window, stride=1 (fused path, general selection network, lower-middle rule).
    pool4 = MedianPool1d(kernel_size=4, stride=1, padding=0, same=True)
    out4 = jax.block_until_ready(pool4(x))
    ref4 = _median_reference(x, 4, 1, 0, True)
    assert out4.shape == ref4.shape
    assert jnp.allclose(out4, ref4), "k=4 stride=1 mismatch vs reference"

    # 3) k=5, stride=2, explicit padding (stacked strided-slice path).
    pool5 = MedianPool1d(kernel_size=5, stride=2, padding=2, same=False)
    out5 = jax.block_until_ready(pool5(x))
    ref5 = _median_reference(x, 5, 2, 2, False)
    assert out5.shape == ref5.shape
    assert jnp.allclose(out5, ref5), "k=5 stride=2 mismatch vs reference"

    print("KERNEL_OK")
</pallas_src>

<mosaic_0001>
module attributes {stable_mosaic.version = 11 : i64} {
  func.func @_median_rows_kernel(%arg0: i32, %arg1: memref<8x256xf32, #tpu.memory_space<vmem>>, %arg2: memref<8x128xf32, #tpu.memory_space<vmem>>) attributes {dimension_semantics = [#tpu.dimension_semantics<parallel>], iteration_bounds = array<i64: 1>, scalar_prefetch = 0 : i64, scratch_operands = 0 : i64, tpu.core_type = #tpu.core_type<tc>, window_params = [{transform_indices = @transform_0, window_bounds = array<i64: 8, 256>}, {transform_indices = @transform_1, window_bounds = array<i64: 8, 128>}]} {
    %c0 = arith.constant 0 : index
    %c0_0 = arith.constant 0 : index
    %0 = vector.load %arg1[%c0, %c0_0] : memref<8x256xf32, #tpu.memory_space<vmem>>, vector<8x128xf32>
    %c0_1 = arith.constant 0 : index
    %c1 = arith.constant 1 : index
    %1 = vector.load %arg1[%c0_1, %c1] : memref<8x256xf32, #tpu.memory_space<vmem>>, vector<8x128xf32>
    %c0_2 = arith.constant 0 : index
    %c2 = arith.constant 2 : index
    %2 = vector.load %arg1[%c0_2, %c2] : memref<8x256xf32, #tpu.memory_space<vmem>>, vector<8x128xf32>
    %3 = arith.minimumf %0, %1 : vector<8x128xf32>
    %4 = arith.maximumf %0, %1 : vector<8x128xf32>
    %5 = arith.minimumf %4, %2 : vector<8x128xf32>
    %6 = arith.maximumf %3, %5 : vector<8x128xf32>
    %c0_3 = arith.constant 0 : index
    %c0_4 = arith.constant 0 : index
    %7 = vector.load %arg2[%c0_3, %c0_4] : memref<8x128xf32, #tpu.memory_space<vmem>>, vector<8x128xf32>
    tpu.vector_store %arg2[%c0_3, %c0_4], %6 {strides = array<i32>} : memref<8x128xf32, #tpu.memory_space<vmem>>, vector<8x128xf32>,
    return
  }
  func.func @transform_0(%arg0: i32) -> (i32, i32) {
    %c0_i32 = arith.constant 0 : i32
    %c0_i32_0 = arith.constant 0 : i32
    return %arg0, %c0_i32 : i32, i32
  }
  func.func @transform_1(%arg0: i32) -> (i32, i32) {
    %c0_i32 = arith.constant 0 : i32
    %c0_i32_0 = arith.constant 0 : i32
    return %arg0, %c0_i32 : i32, i32
  }
}

</mosaic_0001>

<bundles_post_ra>
// kernel: tpu_custom_call.1
= control target key start
LH: loop header
LB: loop body
LE: loop exit
PB: predicated region body
PF: predicated region fallthrough
CT: control target
= control target key end

     0   :  { %6 = vsyncpa [#allocation3], 0  ;;  %s128_s0 = inlined_call_operand.hbm [shape: f32[8,256], index: 0, kind: input, shape index: {}]   ;;  %s129_s1 = inlined_call_operand.hbm [shape: f32[8,128], index: 1, kind: output, shape index: {}]  }
   0x1   :  { %7 = vsyncpa [#allocation4], 0  ;;  %s108_s6 = smov [#allocation2]  }
   0x2   :  { %s14_s7 = sshll.u32 %s108_s6, 4  ;;  %s15_s7 = int_to_ptr.vmem [resolvable:$true] %s14_s7 }
   0x3   :  { %s72_s8 = scalar_lea.vmem %s15_s7, 256  ;;  %p77_p1 = scmp.lt.s32.totalorder %s15_s7, %s15_s7 }
   0x4   :  { %p73_p0 = scmp.ne.s32.totalorder %s15_s7, %s72_s8  ;;  %p78_p2 = scmp.lt.s32.totalorder %s72_s8, %s72_s8 }
   0x6   :  { %p79_p3 = por %p78_p2, %p77_p1 }
   0x8   :  { %p80_p4 = pnand %p79_p3, %p73_p0 }
   0xa   :  { %83 = shalt.err (!%p80_p4)
}
   0xb   :  { %17 = dma.hbm_to_vmem [thread:$0]  %s128_s0, 256, %s15_s7, [#allocation3]  }
   0xc   :  { %104 = dma.done.wait [#allocation3], 256  }
   0xd   :  { %105 = vsyncadd [#allocation3], 4294967040  ;;  %v22_v0 = vld [vmem:[#allocation2] sm:$0xff]  ;;  %s109_s11 = smov 126   ;;  %s110_s12 = smov 127   ;;  %v23_v1 = vld [vmem:[#allocation2 + $0x8] sm:$0xff] }
   0xe   :  { %35 = vrot.lane.b32.xlu1 %v22_v0, %s109_s11  ;;  %26 = vrot.lane.b32.xlu0 %v22_v0, %s110_s12  ;;  %vm30_vm0 = vcmask 1039360   ;;  %vm39_vm1 = vcmask 1031168   ;;  %s111_s0 = smov [#allocation5]  }
   0xf   :  { %s51_s13 = sshll.u32 %s111_s0, 4  ;;  %s52_s13 = int_to_ptr.vmem [resolvable:$true] %s51_s13 }
  0x10   :  { %s84_s14 = scalar_lea.vmem %s52_s13, 128  ;;  %p89_p6 = scmp.lt.s32.totalorder %s52_s13, %s52_s13 }
  0x11   :  { %p85_p5 = scmp.ne.s32.totalorder %s52_s13, %s84_s14  ;;  %p90_p7 = scmp.lt.s32.totalorder %s84_s14, %s84_s14 }
  0x12   :  { %37 = vrot.lane.b32.xlu1 %v23_v1, %s109_s11  ;;  %28 = vrot.lane.b32.xlu0 %v23_v1, %s110_s12 }
  0x13   :  { %p91_p8 = por %p90_p7, %p89_p6 }
  0x15   :  { %p92_p9 = pnand %p91_p8, %p85_p5 }
  0x80   :  { %v36_v2 = vpop.permute.xlu1 %35  ;;  %v27_v3 = vpop.permute.xlu0 %26 }
  0x84   :  { %v38_v4 = vpop.permute.xlu1 %37  ;;  %v29_v5 = vpop.permute.xlu0 %28 }
  0x85   :  { %v31_v6 = vsel %vm30_vm0, %v27_v3, %v29_v5  ;;  %v40_v8 = vsel %vm39_vm1, %v36_v2, %v38_v4 }
  0x86   :  { %v34_v7 = vmax.f32 %v22_v0, %v31_v6  ;;  %v33_v9 = vmin.f32 %v22_v0, %v31_v6 }
  0x88   :  { %v42_v10 = vmin.f32 %v34_v7, %v40_v8 }
  0x8a   :  { %v43_v11 = vmax.f32 %v33_v9, %v42_v10 }
  0x8c   :  { %44 = vst [vmem:[#allocation5] sm:$0xff] %v43_v11 }
  0x8d   :  { %95 = shalt.err (!%p92_p9)
}
  0x8e   :  { %54 = dma.vmem_to_hbm [thread:$0]  %s52_s13, 128, %s129_s1, [#allocation4]  }
  0x8f   :  { %106 = dma.done.wait [#allocation4], 128  }
  0x90   :  { %107 = vsyncadd [#allocation4], 4294967168 }
  0x91   :  { %58 = vsyncpa [#allocation3], 1 }
  0x92   :  { %59 = vsyncpa [#allocation4], 1 }

</bundles_post_ra>
